<compile_context>
chip_gen: v5e
topology: v5e:2x2
jax: 0.10.0
libtpu: 0.0.40
codegen_flags: <defaults>
</compile_context>

<pallas_src>
import functools

import jax
import jax.numpy as jnp
from jax.experimental import pallas as pl
from jax.experimental.pallas import tpu as pltpu

_LANES = 128
_MAX_CHUNKS = 128   # cap on static unrolling of the per-tile chunk loop


def _channel_attention_kernel(x_ref, w1_ref, w2_ref, o_ref, max_acc, sum_acc,
                              *, hw_total, num_tiles, needs_mask):
    # x_ref:   (C, HW_TILE)  current spatial tile (native dtype, batch squeezed)
    # w1_ref:  (Cr, C)       first 1x1 conv weight
    # w2_ref:  (C, Cr)       second 1x1 conv weight
    # o_ref:   (C, 1)        sigmoid(se(max) + se(avg)) for this batch element
    # max_acc / sum_acc: (C, 128) f32 lane-shaped running accumulators
    k = pl.program_id(1)
    C, hw_tile = x_ref.shape
    last = num_tiles - 1

    @pl.when(k == 0)
    def _init():
        max_acc[...] = jnp.full(max_acc.shape, -jnp.inf, dtype=max_acc.dtype)
        sum_acc[...] = jnp.zeros(sum_acc.shape, dtype=sum_acc.dtype)

    def _accumulate(valid):
        # `valid` is a static Python int: number of valid elements in the tile.
        n_full = valid // _LANES
        rem = valid - n_full * _LANES
        tile_max = None
        tile_sum = None

        def merge(cmax, csum):
            nonlocal tile_max, tile_sum
            if tile_max is None:
                tile_max, tile_sum = cmax, csum
            else:
                tile_max = jnp.maximum(tile_max, cmax)
                tile_sum = tile_sum + csum

        # Fully-valid 128-lane chunks: pure elementwise (VALU) accumulation.
        for i in range(n_full):
            c = x_ref[:, i * _LANES:(i + 1) * _LANES].astype(jnp.float32)
            merge(c, c)
        # Single partially-valid chunk (only exists on the masked last tile).
        if rem:
            c = x_ref[:, n_full * _LANES:(n_full + 1) * _LANES].astype(jnp.float32)
            lane = jax.lax.broadcasted_iota(jnp.int32, c.shape, 1)
            m = lane < rem
            merge(jnp.where(m, c, -jnp.inf), jnp.where(m, c, 0.0))
        # Chunks entirely past `valid` are skipped statically (zero cost).

        # One RMW per tile on the persistent accumulators.
        max_acc[...] = jnp.maximum(max_acc[...], tile_max)
        sum_acc[...] = sum_acc[...] + tile_sum

    if needs_mask:
        valid_last = hw_total - last * hw_tile
        if num_tiles > 1:
            @pl.when(k != last)
            def _body_unmasked():
                _accumulate(hw_tile)

        @pl.when(k == last)
        def _body_masked():
            _accumulate(valid_last)
    else:
        _accumulate(hw_tile)

    @pl.when(k == last)
    def _finalize():
        # Single cross-lane reduce (XLU), once per batch element.
        max_p = jnp.max(max_acc[...], axis=-1, keepdims=True)                 # (C, 1)
        avg_p = jnp.sum(sum_acc[...], axis=-1, keepdims=True) * jnp.float32(1.0 / hw_total)
        pooled = jnp.concatenate([max_p, avg_p], axis=-1)                     # (C, 2)

        # Fused SE epilogue on both branches at once; native-dtype weights
        # with f32 accumulation (single-pass MXU for bf16 weights).
        w1 = w1_ref[...]
        w2 = w2_ref[...]
        h = jnp.dot(w1, pooled.astype(w1.dtype), preferred_element_type=jnp.float32)
        h = jnp.maximum(h, 0.0)                                               # (Cr, 2)
        y = jnp.dot(w2, h.astype(w2.dtype), preferred_element_type=jnp.float32)  # (C, 2)

        out = jax.nn.sigmoid(y[:, 0:1] + y[:, 1:2])                           # (C, 1)
        o_ref[...] = out.astype(o_ref.dtype)


def channel_attention(x, w1, w2, *, hw_tile=None, target_tile_bytes=None):
    """x: (B, C, H, W); w1: (Cr, C) [Conv2d(C,Cr,1) weight squeezed];
    w2: (C, Cr). Returns (B, C, 1, 1) == sigmoid(se(maxpool) + se(avgpool))."""
    B, C, H, W = x.shape
    Cr = w1.shape[0]
    HW = H * W
    assert w1.shape == (Cr, C) and w2.shape == (C, Cr)
    # -inf sentinel requires a float input dtype (f32 / bf16 etc.).
    assert jnp.issubdtype(x.dtype, jnp.floating), "channel_attention needs float input"

    x_flat = x.reshape(B, C, HW)
    itemsize = jnp.dtype(x.dtype).itemsize

    # Tiny spatial extents: pad up to one full lane group so every in-kernel
    # chunk is exactly 128 lanes; the padded tail is masked inside the kernel.
    if HW < _LANES:
        x_flat = jnp.pad(x_flat, ((0, 0), (0, 0), (0, _LANES - HW)))
    hw_arr = x_flat.shape[-1]

    # Generation-aware VMEM budget / tile target.
    try:
        vmem_cap = int(pltpu.get_tpu_info().vmem_capacity_bytes)
    except Exception:
        vmem_cap = 64 << 20          # conservative default (v7x per-core)
    if target_tile_bytes is None:
        # ~16 MiB on 128-MiB parts (v5e/v6e), ~8 MiB on 64-MiB v7x.
        target_tile_bytes = int(min(16 << 20, max(2 << 20, vmem_cap // 8)))

    # Largest legal tile: a 128-multiple not larger than a whole block past
    # the array (last block may be partial, which is the standard case).
    max_tile = max(_LANES, (hw_arr // _LANES) * _LANES)
    if hw_tile is None:
        lanes = max(4 * _LANES, target_tile_bytes // max(1, C * itemsize))
        lanes = min(lanes, _MAX_CHUNKS * _LANES)
        hw_tile = (lanes // _LANES) * _LANES
    hw_tile = max(_LANES, min((hw_tile // _LANES) * _LANES, max_tile))

    num_tiles = int(pl.cdiv(hw_arr, hw_tile))
    needs_mask = (HW % hw_tile) != 0

    # VMEM limit: triple-buffered input tiles + weights + accumulators + slack,
    # clamped to a safe fraction of this generation's physical VMEM.
    tile_bytes = C * hw_tile * itemsize
    acc_bytes = 2 * C * _LANES * 4
    w_bytes = 4 * C * Cr * jnp.dtype(w1.dtype).itemsize
    need = 3 * tile_bytes + acc_bytes + w_bytes + (2 << 20)
    vmem_limit = int(min(max(16 << 20, need), vmem_cap * 5 // 8))

    kernel = functools.partial(
        _channel_attention_kernel,
        hw_total=HW, num_tiles=num_tiles, needs_mask=needs_mask)

    out = pl.pallas_call(
        kernel,
        out_shape=jax.ShapeDtypeStruct((B, C, 1), x.dtype),
        grid_spec=pltpu.PrefetchScalarGridSpec(
            num_scalar_prefetch=0,
            grid=(B, num_tiles),
            in_specs=[
                pl.BlockSpec((None, C, hw_tile), lambda b, k: (b, 0, k)),
                pl.BlockSpec((Cr, C), lambda b, k: (0, 0)),
                pl.BlockSpec((C, Cr), lambda b, k: (0, 0)),
            ],
            out_specs=pl.BlockSpec((None, C, 1), lambda b, k: (b, 0, 0)),
            scratch_shapes=[
                pltpu.VMEM((C, _LANES), jnp.float32),   # running max (lane-shaped)
                pltpu.VMEM((C, _LANES), jnp.float32),   # running sum (lane-shaped)
            ],
        ),
        compiler_params=pltpu.CompilerParams(
            dimension_semantics=("parallel", "arbitrary"),
            vmem_limit_bytes=vmem_limit,
        ),
    )(x_flat, w1, w2)

    return out.reshape(B, C, 1, 1)


def reference(x, w1, w2):
    """Pure-JAX reference mirroring the PyTorch forward (computed in f32)."""
    xf = x.astype(jnp.float32)
    w1f = w1.astype(jnp.float32)
    w2f = w2.astype(jnp.float32)
    max_p = jnp.max(xf, axis=(2, 3))      # (B, C)
    avg_p = jnp.mean(xf, axis=(2, 3))     # (B, C)

    def se(p):
        h = jnp.maximum(p @ w1f.T, 0.0)
        return h @ w2f.T

    return jax.nn.sigmoid(se(max_p) + se(avg_p))[:, :, None, None]


def _make_inputs(key, B, C, H, W, reduction, dtype):
    Cr = max(1, C // reduction)
    kx, k1, k2 = jax.random.split(key, 3)
    x = jax.random.normal(kx, (B, C, H, W), dtype=jnp.float32).astype(dtype)
    w1 = (jax.random.normal(k1, (Cr, C), dtype=jnp.float32) * (1.0 / (C ** 0.5))).astype(dtype)
    w2 = (jax.random.normal(k2, (C, Cr), dtype=jnp.float32) * (1.0 / (Cr ** 0.5))).astype(dtype)
    return x, w1, w2


if __name__ == "__main__":
    key = jax.random.PRNGKey(0)
    k1, k2, k3 = jax.random.split(key, 3)

    # 1a) f32, HW multiple of the tile, forced 2-step grid (accumulate + finalize).
    x, w1, w2 = _make_inputs(k1, B=2, C=4, H=16, W=16, reduction=1, dtype=jnp.float32)
    out = jax.block_until_ready(channel_attention(x, w1, w2, hw_tile=128))
    ref = reference(x, w1, w2)
    assert out.shape == (2, 4, 1, 1)
    assert jnp.allclose(out, ref, atol=1e-5, rtol=1e-5)

    # 1b) same inputs, autosized tile (single-tile path).
    out = jax.block_until_ready(channel_attention(x, w1, w2))
    assert jnp.allclose(out, ref, atol=1e-5, rtol=1e-5)

    # 2) bf16, C not a multiple of 128, HW not a multiple of the tile (masked tail).
    xb, w1b, w2b = _make_inputs(k2, B=2, C=12, H=12, W=12, reduction=2, dtype=jnp.bfloat16)
    outb = jax.block_until_ready(channel_attention(xb, w1b, w2b, hw_tile=128))
    refb = reference(xb, w1b, w2b)
    assert outb.shape == (2, 12, 1, 1)
    assert jnp.allclose(outb.astype(jnp.float32), refb, atol=3e-2, rtol=3e-2)

    # 3) HW smaller than one lane group (pad + mask path).
    xs, w1s, w2s = _make_inputs(k3, B=2, C=4, H=8, W=8, reduction=1, dtype=jnp.float32)
    outs = jax.block_until_ready(channel_attention(xs, w1s, w2s))
    refs = reference(xs, w1s, w2s)
    assert outs.shape == (2, 4, 1, 1)
    assert jnp.allclose(outs, refs, atol=1e-5, rtol=1e-5)

    print("KERNEL_OK")
</pallas_src>

<mosaic_0001>
module attributes {stable_mosaic.version = 11 : i64} {
  func.func @_channel_attention_kernel(%arg0: i32, %arg1: i32, %arg2: memref<1x4x128xf32, #tpu.memory_space<vmem>>, %arg3: memref<4x4xf32, #tpu.memory_space<vmem>>, %arg4: memref<4x4xf32, #tpu.memory_space<vmem>>, %arg5: memref<1x4x1xf32, #tpu.memory_space<vmem>>, %arg6: memref<4x128xf32, #tpu.memory_space<vmem>>, %arg7: memref<4x128xf32, #tpu.memory_space<vmem>>) attributes {dimension_semantics = [#tpu.dimension_semantics<parallel>, #tpu.dimension_semantics<arbitrary>], iteration_bounds = array<i64: 2, 2>, scalar_prefetch = 0 : i64, scratch_operands = 2 : i64, tpu.core_type = #tpu.core_type<tc>, window_params = [{transform_indices = @transform_0, window_bounds = array<i64: 1, 4, 128>}, {pipeline_mode = #tpu.pipeline_mode<synchronous>, transform_indices = @transform_1, window_bounds = array<i64: 4, 4>}, {pipeline_mode = #tpu.pipeline_mode<synchronous>, transform_indices = @transform_2, window_bounds = array<i64: 4, 4>}, {transform_indices = @transform_3, window_bounds = array<i64: 1, 4, 1>}]} {
    %c0_i32 = arith.constant 0 : i32
    %0 = arith.cmpi eq, %arg1, %c0_i32 : i32
    %1 = arith.extui %0 : i1 to i32
    %c0_i32_0 = arith.constant 0 : i32
    %2 = arith.cmpi ne, %1, %c0_i32_0 : i32
    scf.if %2 {
      %cst = arith.constant 0xFF800000 : f32
      %14 = vector.broadcast %cst : f32 to vector<4x128xf32>
      %c0_12 = arith.constant 0 : index
      %c0_13 = arith.constant 0 : index
      %15 = vector.load %arg6[%c0_12, %c0_13] : memref<4x128xf32, #tpu.memory_space<vmem>>, vector<4x128xf32>
      tpu.vector_store %arg6[%c0_12, %c0_13], %14 {strides = array<i32>} : memref<4x128xf32, #tpu.memory_space<vmem>>, vector<4x128xf32>,
      %cst_14 = arith.constant 0.000000e+00 : f32
      %16 = vector.broadcast %cst_14 : f32 to vector<4x128xf32>
      %c0_15 = arith.constant 0 : index
      %c0_16 = arith.constant 0 : index
      %17 = vector.load %arg7[%c0_15, %c0_16] : memref<4x128xf32, #tpu.memory_space<vmem>>, vector<4x128xf32>
      tpu.vector_store %arg7[%c0_15, %c0_16], %16 {strides = array<i32>} : memref<4x128xf32, #tpu.memory_space<vmem>>, vector<4x128xf32>,
    } else {
    }
    %c0 = arith.constant 0 : index
    %c0_1 = arith.constant 0 : index
    %c0_2 = arith.constant 0 : index
    %3 = vector.load %arg2[%c0, %c0_1, %c0_2] : memref<1x4x128xf32, #tpu.memory_space<vmem>>, vector<1x4x128xf32>
    %4 = vector.shape_cast %3 : vector<1x4x128xf32> to vector<4x128xf32>
    %c0_3 = arith.constant 0 : index
    %c0_4 = arith.constant 0 : index
    %5 = vector.load %arg6[%c0_3, %c0_4] : memref<4x128xf32, #tpu.memory_space<vmem>>, vector<4x128xf32>
    %6 = arith.maximumf %5, %4 : vector<4x128xf32>
    %c0_5 = arith.constant 0 : index
    %c0_6 = arith.constant 0 : index
    %7 = vector.load %arg6[%c0_5, %c0_6] : memref<4x128xf32, #tpu.memory_space<vmem>>, vector<4x128xf32>
    tpu.vector_store %arg6[%c0_5, %c0_6], %6 {strides = array<i32>} : memref<4x128xf32, #tpu.memory_space<vmem>>, vector<4x128xf32>,
    %c0_7 = arith.constant 0 : index
    %c0_8 = arith.constant 0 : index
    %8 = vector.load %arg7[%c0_7, %c0_8] : memref<4x128xf32, #tpu.memory_space<vmem>>, vector<4x128xf32>
    %9 = arith.addf %8, %4 : vector<4x128xf32>
    %c0_9 = arith.constant 0 : index
    %c0_10 = arith.constant 0 : index
    %10 = vector.load %arg7[%c0_9, %c0_10] : memref<4x128xf32, #tpu.memory_space<vmem>>, vector<4x128xf32>
    tpu.vector_store %arg7[%c0_9, %c0_10], %9 {strides = array<i32>} : memref<4x128xf32, #tpu.memory_space<vmem>>, vector<4x128xf32>,
    %c1_i32 = arith.constant 1 : i32
    %11 = arith.cmpi eq, %arg1, %c1_i32 : i32
    %12 = arith.extui %11 : i1 to i32
    %c0_i32_11 = arith.constant 0 : i32
    %13 = arith.cmpi ne, %12, %c0_i32_11 : i32
    scf.if %13 {
      %c0_12 = arith.constant 0 : index
      %c0_13 = arith.constant 0 : index
      %14 = vector.load %arg6[%c0_12, %c0_13] : memref<4x128xf32, #tpu.memory_space<vmem>>, vector<4x128xf32>
      %cst = arith.constant dense<0xFF800000> : vector<4xf32>
      %15 = vector.multi_reduction <maximumf>, %14, %cst [1] : vector<4x128xf32> to vector<4xf32>
      %16 = vector.shape_cast %15 : vector<4xf32> to vector<4x1xf32>
      %c0_14 = arith.constant 0 : index
      %c0_15 = arith.constant 0 : index
      %17 = vector.load %arg7[%c0_14, %c0_15] : memref<4x128xf32, #tpu.memory_space<vmem>>, vector<4x128xf32>
      %cst_16 = arith.constant dense<0.000000e+00> : vector<4xf32>
      %18 = vector.multi_reduction <add>, %17, %cst_16 [1] : vector<4x128xf32> to vector<4xf32>
      %19 = vector.shape_cast %18 : vector<4xf32> to vector<4x1xf32>
      %cst_17 = arith.constant 3.906250e-03 : f32
      %20 = vector.broadcast %cst_17 : f32 to vector<4x1xf32>
      %21 = arith.mulf %19, %20 : vector<4x1xf32>
      %22 = tpu.concatenate %16, %21 in 1 : vector<4x1xf32>, vector<4x1xf32> -> vector<4x2xf32>
      %c0_18 = arith.constant 0 : index
      %c0_19 = arith.constant 0 : index
      %23 = vector.load %arg3[%c0_18, %c0_19] : memref<4x4xf32, #tpu.memory_space<vmem>>, vector<4x4xf32>
      %c0_20 = arith.constant 0 : index
      %c0_21 = arith.constant 0 : index
      %24 = vector.load %arg4[%c0_20, %c0_21] : memref<4x4xf32, #tpu.memory_space<vmem>>, vector<4x4xf32>
      %cst_22 = arith.constant dense<0.000000e+00> : vector<4x2xf32>
      %25 = tpu.matmul %23, %22, %cst_22 {dimension_numbers = #tpu.dot_dimension_numbers<[1], [0], [0], [1], [0, 0, 1, 1], [], []>} : vector<4x4xf32>, vector<4x2xf32>, vector<4x2xf32> -> vector<4x2xf32>
      %cst_23 = arith.constant 0.000000e+00 : f32
      %26 = vector.broadcast %cst_23 : f32 to vector<4x2xf32>
      %27 = arith.maximumf %25, %26 : vector<4x2xf32>
      %cst_24 = arith.constant dense<0.000000e+00> : vector<4x2xf32>
      %28 = tpu.matmul %24, %27, %cst_24 {dimension_numbers = #tpu.dot_dimension_numbers<[1], [0], [0], [1], [0, 0, 1, 1], [], []>} : vector<4x4xf32>, vector<4x2xf32>, vector<4x2xf32> -> vector<4x2xf32>
      %29 = vector.extract_strided_slice %28 {offsets = [0, 0], sizes = [4, 1], strides = [1, 1]} : vector<4x2xf32> to vector<4x1xf32>
      %30 = vector.extract_strided_slice %28 {offsets = [0, 1], sizes = [4, 1], strides = [1, 1]} : vector<4x2xf32> to vector<4x1xf32>
      %31 = arith.addf %29, %30 : vector<4x1xf32>
      %32 = arith.negf %31 : vector<4x1xf32>
      %33 = math.exp %32 : vector<4x1xf32>
      %cst_25 = arith.constant 1.000000e+00 : f32
      %34 = vector.broadcast %cst_25 : f32 to vector<4x1xf32>
      %35 = arith.addf %34, %33 : vector<4x1xf32>
      %36 = arith.divf %34, %35 : vector<4x1xf32>
      %c0_26 = arith.constant 0 : index
      %c0_27 = arith.constant 0 : index
      %c0_28 = arith.constant 0 : index
      %37 = vector.load %arg5[%c0_26, %c0_27, %c0_28] : memref<1x4x1xf32, #tpu.memory_space<vmem>>, vector<1x4x1xf32>
      %38 = vector.shape_cast %37 : vector<1x4x1xf32> to vector<4x1xf32>
      %39 = vector.shape_cast %36 : vector<4x1xf32> to vector<1x4x1xf32>
      tpu.vector_store %arg5[%c0_26, %c0_27, %c0_28], %39 {strides = array<i32>} : memref<1x4x1xf32, #tpu.memory_space<vmem>>, vector<1x4x1xf32>,
    } else {
    }
    return
  }
  func.func @transform_0(%arg0: i32, %arg1: i32) -> (i32, i32, i32) {
    %c0_i32 = arith.constant 0 : i32
    %c0_i32_0 = arith.constant 0 : i32
    return %arg0, %c0_i32, %arg1 : i32, i32, i32
  }
  func.func @transform_1(%arg0: i32, %arg1: i32) -> (i32, i32) {
    %c0_i32 = arith.constant 0 : i32
    %c0_i32_0 = arith.constant 0 : i32
    %c0_i32_1 = arith.constant 0 : i32
    return %c0_i32, %c0_i32_0 : i32, i32
  }
  func.func @transform_2(%arg0: i32, %arg1: i32) -> (i32, i32) {
    %c0_i32 = arith.constant 0 : i32
    %c0_i32_0 = arith.constant 0 : i32
    %c0_i32_1 = arith.constant 0 : i32
    return %c0_i32, %c0_i32_0 : i32, i32
  }
  func.func @transform_3(%arg0: i32, %arg1: i32) -> (i32, i32, i32) {
    %c0_i32 = arith.constant 0 : i32
    %c0_i32_0 = arith.constant 0 : i32
    %c0_i32_1 = arith.constant 0 : i32
    return %arg0, %c0_i32, %c0_i32_0 : i32, i32, i32
  }
}

</mosaic_0001>

<bundles_post_ra>
// kernel: tpu_custom_call.1
= control target key start
LH: loop header
LB: loop body
LE: loop exit
PB: predicated region body
PF: predicated region fallthrough
CT: control target
= control target key end

     0   :  { %s898_s0 = inlined_call_operand.hbm [shape: f32[2,4,256], index: 0, kind: input, shape index: {}]   ;;  %s899_s1 = inlined_call_operand.hbm [shape: f32[4,4], index: 1, kind: input, shape index: {}]   ;;  %s900_s2 = inlined_call_operand.hbm [shape: f32[4,4], index: 2, kind: input, shape index: {}]   ;;  %s901_s3 = inlined_call_operand.vmem [shape: f32[2,4,1], index: 3, kind: output, shape index: {}]  }
   0x1   :  { %903 = sst [smem:[#allocation12_spill]] %s899_s1 }
   0x2   :  { %904 = sst [smem:[#allocation13_spill]] %s900_s2 }
   0x3   :  { %8 = vsyncpa [#allocation5], 0 }
   0x4   :  { %10 = vsyncpa [#allocation5 + $0x1], 0 }
   0x5   :  { %11 = vsyncpa [#allocation7], 0  ;;  %s750_s12 = smov 0   ;;  %s752_s13 = smov 0  }
   0x6   :  { %s754_s14 = smov 0   ;;  %s756_s15 = smov 0  }
   0x7   :  { %s758_s16 = smov 0   ;;  %s760_s17 = smov 0  }
   0x8   :  { %s762_s18 = smov 0   ;;  %s764_s19 = smov 0  }
   0x9 LB: > { %s441_s20 = sadd.s32 4294967295, %s723_s19   ;;  %p51_p0 = scmp.ne.s32.totalorder %s699_s13, %s695_s12  ;;  %s723_s19 = sphi %s764_s19, %s17_s19   ;;  %s719_s18 = sphi %s762_s18, %s919_s18   ;;  %s715_s17 = sphi %s760_s17, %s918_s17   ;;  %s711_s16 = sphi %s758_s16, %s917_s16   ;;  %s707_s15 = sphi %s756_s15, %s916_s15   ;;  %s703_s14 = sphi %s754_s14, %s915_s14   ;;  %s699_s13 = sphi %s752_s13, %s914_s13   ;;  %s695_s12 = sphi %s750_s12, %s913_s12  }
   0xa   : > { %p790_p1 = scmp.eq.s32.totalorder %s441_s20, 0  ;;  %p443_p2 = scmp.ge.s32.totalorder %s723_s19, 1 }
   0xb   : > { %p130_p3 = scmp.lt.s32.totalorder %s723_s19, 5  ;;  %s907_s1 = sld [smem:[#allocation12_spill]] }
   0xc   : > { %p798_p4 = por %p790_p1, %p51_p0  ;;  %s725_s27 = smov [#allocation6]  }
   0xd   : > { %p805_p5 = pnand %p443_p2, %p130_p3  ;;  %s144_s28 = sshll.u32 %s725_s27, 4  ;;  %s145_s28 = int_to_ptr.vmem [resolvable:$true] %s144_s28 }
   0xe   : > { %s909_s2 = sld [smem:[#allocation13_spill]]  ;;  %s726_s5 = smov [#allocation8]  }
   0xf   : > { %p474_p6 = pneg %p805_p5  ;;  %s156_s6 = sshll.u32 %s726_s5, 4  ;;  %s157_s6 = int_to_ptr.vmem [resolvable:$true] %s156_s6 }
  0x10   : > { %s26_s7 = sadd.s32 1, %s715_s17  ;;  %s29_s8 = sadd.s32 1, %s719_s18 }
  0x11   : > { %s142_s25 = sshll.u32 %s907_s1, 4  ;;  %p475_p7 = pnand %p474_p6, %p790_p1  ;;  %s143_s25 = int_to_ptr.hbm [resolvable:$true] %s142_s25 }
  0x12   : > { %p27_p8 = scmp.ge.s32.totalorder %s26_s7, 2  ;;  %s38_s9 = sadd.s32 1, %s703_s14 }
  0x13   : > { %477 = dma.hbm_to_vmem [thread:$0]  (!%p475_p7), %s143_s25, 64, %s145_s28, [#allocation7]  }
  0x14   : > { %s154_s4 = sshll.u32 %s909_s2, 4  ;;  %p45_p9 = scmp.ne.s32.totalorder %s703_s14, %s699_s13  ;;  %s155_s4 = int_to_ptr.hbm [resolvable:$true] %s154_s4 }
  0x15   : > { %480 = dma.hbm_to_vmem [thread:$0]  (!%p475_p7), %s155_s4, 64, %s157_s6, [#allocation7]  }
  0x16   : > { %p46_p10 = scmp.eq.s32.totalorder %s723_s19, 0  ;;  %s921_s7 = smov (%p27_p8, %s26_s7), 0 }
  0x17   : > { %910 = sst [smem:[#allocation11_spill]] %s921_s7  ;;  %s923_s8 = smov (!%p27_p8, %s29_s8), %s719_s18 }
  0x18   : > { %s34_s10 = ssub.s32 %s715_s17, %s921_s7  ;;  %p827_p11 = por %p46_p10, %p45_p9 }
  0x19   : > { %p31_p12 = scmp.ge.s32.totalorder %s923_s8, 2  ;;  %p487_p13 = scmp.lt.s32.totalorder %s723_s19, 4 }
  0x1a   : > { %s167_s12 = sand.u32 1, %s703_s14   ;;  %s448_s20 = sshll.u32 %s719_s18, 1 }
  0x1b   : > { %s925_s8 = smov (%p31_p12, %s923_s8), 0  ;;  %s447_s23 = sshll.u32 %s167_s12, 2 }
  0x1c   : > { %s33_s24 = ssub.s32 %s719_s18, %s925_s8  ;;  %s175_s27 = sadd.s32 %s715_s17, %s448_s20 }
  0x1d   : > { %s35_s25 = sor.u32 %s34_s10, %s33_s24  ;;  %s449_s28 = sshll.u32 %s175_s27, 2 }
  0x1e   : > { %p36_p0 = scmp.eq.s32.totalorder %s35_s25, 0  ;;  %s177_s4 = scalar_lea.hbm %s898_s0, %s449_s28 }
  0x1f   : > { %s171_s5 = scalar_lea.vmem [#allocation4], %s447_s23  ;;  %s179_s2 = sshll.u32 %s177_s4, 4  ;;  %s180_s2 = int_to_ptr.hbm [resolvable:$true] %s179_s2 }
  0x20   : > { %s181_s6 = sshll.u32 %s171_s5, 4  ;;  %p482_p2 = pnand %p487_p13, %p827_p11  ;;  %s182_s6 = int_to_ptr.vmem [resolvable:$true] %s181_s6 }
  0x21   : > { %s843_s1 = scalar_select %p36_p0, %s703_s14, %s38_s9  }
  0x22   : > { %s168_s7 = scalar_lea.sflag [#allocation5], %s167_s12  ;;  %190 = sbr.rel (%p805_p5) target bundleno = 597 (0x255), region = 32 }
  0x23   : > { %484 = dma.hbm_to_vmem [thread:$0]  (!%p482_p2), %s180_s2, 64, %s182_s6, %s168_s7  }
  0x24   : > { %s192_s10 = sand.u32 (!%p805_p5), 1, %s699_s13  }
  0x25   : > { %s451_s20 = sshll.u32 (!%p805_p5), %s192_s10, 2  ;;  %s193_s24 = scalar_lea.sflag (!%p805_p5), [#allocation5], %s192_s10 }
  0x26   : > { %s196_s23 = scalar_lea.vmem (!%p805_p5), [#allocation4], %s451_s20 }
  0x27   : > { %686 = dma.done.wait (%p798_p4), %s193_s24, 64  }
  0x28   : > { %688 = vsyncadd (%p798_p4), %s193_s24, 4294967232 }
  0x29   : > { %690 = dma.done.wait (%p790_p1), [#allocation7], 128  }
  0x2a   : > { %692 = vsyncadd (%p790_p1), [#allocation7], 4294967168  ;;  %p229_p3 = scmp.lt.s32.totalorder %s711_s16, 1  ;;  %p455_p5 = scmp.ne.s32.totalorder %s707_s15, 0 }
  0x2c   : > { %s927_s16 = smov (!%p229_p3, %s711_s16), 1  ;;  %236 = sbr.rel (%p455_p5) target bundleno = 52 (0x34), region = 48 }
  0x2d   : > { %s454_s2 = sshll.u32 %s927_s16, 2 }
  0x2e   : > { %s865_s9 = scalar_lea.vmem %s901_s3, %s454_s2 }
  0x31   : > { %v727_v0 = vmov -inf   ;;  %v728_v1 = vmov 0.0  }
  0x32   : > { %237 = vst [vmem:[#allocation2] sm:$0xf] %v727_v0 }
  0x33   : > { %238 = vst [vmem:[#allocation3] sm:$0xf] %v728_v1 }
  0x34 PF: > { %v239_v2 = vld [vmem:[%s196_s23] sm:$0xf]  ;;  %p456_p1 = scmp.ne.s32.totalorder %s707_s15, 1 }
  0x35   : > { %s729_s15 = smov (!%p456_p1), 127  }
  0x39   : > { %v240_v3 = vld [vmem:[#allocation2] sm:$0xf]  ;;  %249 = sbr.rel (%p456_p1) target bundleno = 597 (0x255), region = 52 }
  0x3a   : > { %v243_v4 = vld [vmem:[#allocation3] sm:$0xf]  ;;  %v241_v5 = vmax.f32 %v240_v3, %v239_v2 }
  0x3b   : > { %v244_v6 = vadd.f32 %v243_v4, %v239_v2 }
  0x3c   : > { %242 = vst [vmem:[#allocation2] sm:$0xf] %v241_v5 }
  0x3d   : > { %245 = vst [vmem:[#allocation3] sm:$0xf] %v244_v6 }
  0x3e   : > { %vm251_vm0 = vcmask 1043456   ;;  %vm260_vm1 = vcmask 7168   ;;  %v262_v14 = vld [vmem:[#allocation6] sm:$0xf]  ;;  %vm264_vm2 = vcmask 31744   ;;  %vm342_vm5 = vcmask 3072  }
  0x3f   : > { %v263_v18 = vld [vmem:[#allocation8] sm:$0xf] }
  0x43   : > { %v250_v9 = vld [vmem:[#allocation2] sm:$0xf] }
  0x44   : > { %v255_v7 = vld [vmem:[#allocation3] sm:$0xf]  ;;  %v252_v10 = vsel %vm251_vm0, %v250_v9, -inf }
  0x45   : > { %v256_v8 = vsel %vm251_vm0, %v255_v7, 0.0 }
  0x46   : > { %257 = vadd.xlane.f32.xlu0 %v256_v8 }
  0x4e   : > { %253 = vmax.xlane.f32.xlu0 %v252_v10 }
  0xb9   : > { %v258_v11 = vpop.xlane.xlu0 %257 }
  0xba   : > { %v259_v12 = vmul.f32 0.00390625, %v258_v11 }
  0xc1   : > { %v254_v13 = vpop.xlane.xlu0 %253 }
  0xc2   : > { %v261_v15 = vsel %vm260_vm1, %v254_v13, %v259_v12 }
  0xc3   : > { %457 = vmatpush.msk.msra.mxu0 %vm251_vm0, %v261_v15 }
  0xc4   : > { %458 = vmatmul.msk.f32.vlgmr.msra.gmra.mxu0 %vm264_vm2, %v262_v14 }
 0x141   : > { %v288_v16 = vpop.f32.mrf.mxu0 }
 0x142   : > { %v291_v17 = vmax.f32 %v288_v16, 0.0 }
 0x144   : > { %459 = vmatpush.msk.msra.mxu1 %vm251_vm0, %v291_v17 }
 0x145   : > { %460 = vmatmul.msk.f32.vlgmr.msra.gmra.mxu1 %vm264_vm2, %v263_v18 }
 0x1c2   : > { %v315_v19 = vpop.f32.mrf.mxu1 }
 0x1c3   : > { %319 = vrot.lane.b32.xlu1 %v315_v19, %s729_s15 }
 0x235   : > { %v320_v20 = vpop.permute.xlu1 %319 }
 0x236   : > { %v322_v21 = vadd.f32 %v320_v20, %v315_v19 }
 0x238   : > { %v461_v22 = vmul.f32 -1.442695, %v322_v21 }
 0x23a   : > { %559 = vpow2.f32 %v461_v22 }
 0x240   : > { %v560_v23 = vpop.eup %559 }
 0x241   : > { %v326_v24 = vadd.f32 1.0, %v560_v23 }
 0x243   : > { %561 = vrcp.f32 %v326_v24  ;;  %v338_v28 = vand.u32 2147483648, %v326_v24  ;;  %v336_v30 = vand.u32 2147483647, %v326_v24  ;;  %vm332_vm4 = vweird.f32 %v326_v24 }
 0x245   : > { %v339_v32 = vor.u32 1.1754944e-38, %v338_v28  ;;  %vm337_vm7 = vcmp.eq.f32.partialorder %v336_v30, 8.507059e+37 }
 0x249   : > { %v562_v25 = vpop.eup %561 }
 0x24a   : > { %v328_v26 = vmul.f32 %v562_v25, %v326_v24  ;;  %vm333_vm3 = vweird.f32 %v562_v25 }
 0x24b   : > { %vm334_vm6 = vmor %vm332_vm4, %vm333_vm3 }
 0x24c   : > { %v329_v27 = vsub.f32 1.0, %v328_v26 }
 0x24e   : > { %v330_v29 = vmul.f32 %v562_v25, %v329_v27 }
 0x250   : > { %v331_v31 = vadd.f32 %v562_v25, %v330_v29 }
 0x252   : > { %v335_v33 = vsel %vm334_vm6, %v562_v25, %v331_v31 }
 0x253   : > { %v340_v34 = vsel %vm337_vm7, %v339_v32, %v335_v33 }
 0x254   : > { %343 = vst.msk [vmem:[%s865_s9] sm:$0xf] %vm342_vm5, %v340_v34 }
 0x255 PF: > { %s17_s19 = sadd.s32 1, %s723_s19   ;;  %s912_s21 = sld [smem:[#allocation11_spill]] }
 0x256   : > { %p14_p4 = scmp.ge.s32.totalorder %s17_s19, 6   ;;  %s913_s12 = smov %s699_s13 }
 0x257   : > { %s914_s13 = smov %s703_s14  ;;  %s915_s14 = smov %s843_s1 }
 0x258   : > { %s916_s15 = smov %s715_s17  ;;  %s917_s16 = smov %s719_s18 }
 0x259   : > { %s919_s18 = smov %s925_s8  ;;  %16 = sbr.rel (!%p14_p4) target bundleno = 9 (0x9), region = 88 }
 0x25b   : > { %s918_s17 = smov %s912_s21 }
 0x25e   :  { %363 = vsyncpa [#allocation5], 1 }
 0x25f   :  { %365 = vsyncpa [#allocation5 + $0x1], 1 }
 0x260   :  { %366 = vsyncpa [#allocation7], 1 }

</bundles_post_ra>
